<compile_context>
chip_gen: v5e
topology: v5e:2x2
jax: 0.10.0
libtpu: 0.0.40
codegen_flags: <defaults>
</compile_context>

<pallas_src>
import functools
import math

import jax
import jax.numpy as jnp
from jax import lax
from jax.experimental import pallas as pl
from jax.experimental.pallas import tpu as pltpu


def _fused_kernel(vert_ref, hor_ref, val_ref, res_ref, mask_ref,
                  wq_ref, wk_ref, wfc_ref, o_ref,
                  k_s, ctx_s, *, n_heads, d_k, d_v):
    """One (batch, query-tile) step of the whole HierarchicalAttention forward.

    vert_ref : [TQ, D] f32     hor_ref : [SK, D] f32     val_ref : [SK, H*dv] f32
    res_ref  : [TQ, D] f32     mask_ref: [TQ, SK] int8 (nonzero == masked)
    wq_ref   : [H*dk, D] bf16  wk_ref  : [H*dk, D] bf16  wfc_ref : [D, H*dv] bf16
    o_ref    : [TQ, D] f32
    k_s      : [SK, H*dk] bf16 VMEM scratch (persists across q-tiles of a batch)
    ctx_s    : [TQ, H*dv] f32  VMEM scratch (context slab)
    """
    f32 = jnp.float32
    bf16 = jnp.bfloat16
    scale = f32(1.0 / math.sqrt(d_k))
    dn = (((1,), (1,)), ((), ()))   # contract last dims of both -> x @ W^T, no .T

    # --- K projection: ONCE per batch; scratch persists across the q-tile axis ---
    @pl.when(pl.program_id(1) == 0)
    def _():
        k_s[...] = lax.dot_general(hor_ref[...].astype(bf16), wk_ref[...], dn,
                                   preferred_element_type=f32).astype(bf16)

    # --- Q projection for this q-tile; fold 1/sqrt(d_k) into Q (O(S*d)) ---
    q = (lax.dot_general(vert_ref[...].astype(bf16), wq_ref[...], dn,
                         preferred_element_type=f32) * scale).astype(bf16)

    k = k_s[...]                            # [SK, H*dk] bf16
    v = val_ref[...].astype(bf16)           # [SK, H*dv] bf16
    # int8 mask -> boolean once per tile; exact masked_fill(-10000) per head.
    masked = mask_ref[...].astype(f32) != 0.0

    # --- per-head attention (static unroll; all heads in one grid step) ---
    for h in range(n_heads):
        qh = q[:, h * d_k:(h + 1) * d_k]                 # [TQ, dk]
        kh = k[:, h * d_k:(h + 1) * d_k]                 # [SK, dk]
        vh = v[:, h * d_v:(h + 1) * d_v]                 # [SK, dv]

        s = lax.dot_general(qh, kh, dn, preferred_element_type=f32)  # [TQ, SK]
        s = jnp.where(masked, f32(-10000.0), s)          # masked_fill semantics

        m = jnp.max(s, axis=-1, keepdims=True)
        e = jnp.exp(s - m)
        l = jnp.sum(e, axis=-1, keepdims=True)
        # Deferred softmax normalisation: scale the [TQ, dv] context, not the
        # [TQ, SK] probabilities; reciprocal goes to the EUP slot.
        # TODO(synk): dropout(p=0.1) on attn treated as identity (eval mode).
        ctx_h = jnp.dot(e.astype(bf16), vh, preferred_element_type=f32)
        ctx_s[:, h * d_v:(h + 1) * d_v] = ctx_h * pl.reciprocal(l, approx=True)

    # --- fc projection + residual + LayerNorm (gamma=1, beta=0, eps=1e-5) ---
    y = lax.dot_general(ctx_s[...].astype(bf16), wfc_ref[...], dn,
                        preferred_element_type=f32)
    y = y + res_ref[...].astype(f32)
    mean = jnp.mean(y, axis=-1, keepdims=True)
    var = jnp.mean(y * y, axis=-1, keepdims=True) - mean * mean   # one-pass stats
    o_ref[...] = ((y - mean) * lax.rsqrt(var + 1e-5)).astype(o_ref.dtype)


def hierarchical_attention(params, input_vert, input_hor, input_value, attn_mask,
                           n_heads, d_k, residual=None, tile_q=None):
    """Pallas forward equivalent of HierarchicalAttention.forward (eval mode)."""
    B, Sq, D = input_vert.shape
    _, Sk, _ = input_hor.shape
    d_v = d_k
    H = n_heads
    F = H * d_v
    assert input_hor.shape == (B, Sk, D)
    assert input_value.shape == (B, Sk, F)
    res = input_value if residual is None else residual
    assert res.shape == (B, Sq, D)
    assert attn_mask.shape == (B, Sq, Sk)

    if tile_q is None:
        if Sq <= 512:
            tile_q = Sq
        else:
            tile_q = next(t for t in (512, 256, 128, 64, 32) if Sq % t == 0)
    assert Sq % tile_q == 0
    assert tile_q == Sq or tile_q % 32 == 0   # int8 mask sublane tiling
    nq = Sq // tile_q

    # Mask as int8 (1 byte/elem HBM, 4x less than an f32 bias); the -10000 fill
    # happens in-kernel on the VPU, hidden under the MXU.
    mask_i8 = attn_mask.astype(jnp.int8)

    # Weights pre-cast to bf16: halves weight DMA and feeds the MXU natively.
    wq = params["W_Q"].astype(jnp.bfloat16)
    wk = params["W_K"].astype(jnp.bfloat16)
    wfc = params["fc"].astype(jnp.bfloat16)

    kernel = functools.partial(_fused_kernel, n_heads=n_heads, d_k=d_k, d_v=d_v)

    flops = (2 * B * Sq * D * H * d_k        # Q projection
             + 2 * B * Sk * D * H * d_k      # K projection (once per batch)
             + 2 * B * H * Sq * Sk * d_k     # Q K^T
             + 2 * B * H * Sq * Sk * d_v     # attn @ V
             + 2 * B * Sq * F * D)           # fc
    bytes_accessed = (4 * B * Sq * D                    # input_vert
                      + 4 * B * Sk * D                  # input_hor
                      + 4 * B * Sk * F                  # input_value
                      + 4 * B * Sq * D                  # residual
                      + 1 * B * Sq * Sk                 # int8 mask
                      + 2 * (2 * H * d_k * D + D * F)   # bf16 weights
                      + 4 * B * Sq * D)                 # output
    cost = pl.CostEstimate(flops=int(flops),
                           transcendentals=int(B * H * Sq * Sk),
                           bytes_accessed=int(bytes_accessed))

    return pl.pallas_call(
        kernel,
        out_shape=jax.ShapeDtypeStruct((B, Sq, D), jnp.float32),
        grid=(B, nq),
        in_specs=[
            pl.BlockSpec((None, tile_q, D), lambda b, i: (b, i, 0)),    # input_vert
            pl.BlockSpec((None, Sk, D), lambda b, i: (b, 0, 0)),        # input_hor
            pl.BlockSpec((None, Sk, F), lambda b, i: (b, 0, 0)),        # input_value
            pl.BlockSpec((None, tile_q, D), lambda b, i: (b, i, 0)),    # residual
            pl.BlockSpec((None, tile_q, Sk), lambda b, i: (b, i, 0)),   # int8 mask
            pl.BlockSpec((H * d_k, D), lambda b, i: (0, 0)),            # W_Q (bf16)
            pl.BlockSpec((H * d_k, D), lambda b, i: (0, 0)),            # W_K (bf16)
            pl.BlockSpec((D, F), lambda b, i: (0, 0)),                  # fc  (bf16)
        ],
        out_specs=pl.BlockSpec((None, tile_q, D), lambda b, i: (b, i, 0)),
        scratch_shapes=[
            pltpu.VMEM((Sk, H * d_k), jnp.bfloat16),   # K proj (persists per batch)
            pltpu.VMEM((tile_q, F), jnp.float32),      # context slab
        ],
        compiler_params=pltpu.CompilerParams(
            # q-tile axis must be "arbitrary": K-proj scratch written at
            # program_id(1)==0 is reused by the remaining q-tiles of the batch.
            dimension_semantics=("parallel", "arbitrary"),
            vmem_limit_bytes=64 * 1024 * 1024,
        ),
        cost_estimate=cost,
    )(input_vert, input_hor, input_value, res, mask_i8, wq, wk, wfc)


# ---------------------------------------------------------------------------
# Pure-JAX reference (mirrors the PyTorch module exactly, f32, eval-mode dropout)
# ---------------------------------------------------------------------------
def reference(params, input_vert, input_hor, input_value, attn_mask,
              n_heads, d_k, residual=None):
    B, Sq, D = input_vert.shape
    _, Sk, _ = input_hor.shape
    d_v = d_k
    res = input_value if residual is None else residual
    Q = (input_vert @ params["W_Q"].T).reshape(B, Sq, n_heads, d_k).transpose(0, 2, 1, 3)
    K = (input_hor @ params["W_K"].T).reshape(B, Sk, n_heads, d_k).transpose(0, 2, 1, 3)
    V = input_value.reshape(B, Sk, n_heads, d_v).transpose(0, 2, 1, 3)
    scores = jnp.einsum("bhqd,bhkd->bhqk", Q, K) / math.sqrt(d_k)
    scores = jnp.where(attn_mask[:, None, :, :], -10000.0, scores)
    attn = jax.nn.softmax(scores, axis=-1)
    ctx = jnp.einsum("bhqk,bhkd->bhqd", attn, V)
    ctx = ctx.transpose(0, 2, 1, 3).reshape(B, Sq, n_heads * d_v)
    y = ctx @ params["fc"].T + res
    mean = y.mean(-1, keepdims=True)
    var = ((y - mean) ** 2).mean(-1, keepdims=True)
    return (y - mean) / jnp.sqrt(var + 1e-5)


if __name__ == "__main__":
    # Small shapes: batch=2, seq=8, d_model=32, n_heads=4, d_k=d_v=8
    # (d_model == n_heads*d_v as required by the module's V reshape / residual add)
    B, S, d_model, n_heads, d_k = 2, 8, 32, 4, 8

    key = jax.random.PRNGKey(0)
    ks = jax.random.split(key, 8)
    scale = 1.0 / math.sqrt(d_model)
    params = {
        "W_Q": jax.random.uniform(ks[0], (n_heads * d_k, d_model), jnp.float32, -scale, scale),
        "W_K": jax.random.uniform(ks[1], (n_heads * d_k, d_model), jnp.float32, -scale, scale),
        "fc":  jax.random.uniform(ks[2], (d_model, n_heads * d_k), jnp.float32, -scale, scale),
    }

    input_vert  = jax.random.normal(ks[3], (B, S, d_model), jnp.float32)
    input_hor   = jax.random.normal(ks[4], (B, S, d_model), jnp.float32)
    input_value = jax.random.normal(ks[5], (B, S, n_heads * d_k), jnp.float32)
    # Boolean mask: causal-style upper-triangular masking, [B, S, S]
    attn_mask = jnp.triu(jnp.ones((S, S), dtype=bool), k=1)[None].repeat(B, axis=0)

    out = hierarchical_attention(params, input_vert, input_hor, input_value,
                                 attn_mask, n_heads, d_k)
    out = jax.block_until_ready(out)

    ref = reference(params, input_vert, input_hor, input_value, attn_mask, n_heads, d_k)
    assert out.shape == (B, S, d_model)
    err = float(jnp.max(jnp.abs(out - ref)))
    # Tolerance accounts for bf16 MXU operands (f32 accumulation) vs f32 reference.
    assert err < 6e-2, f"mismatch vs reference: {err}"

    print("KERNEL_OK")
</pallas_src>

<mosaic_0001>
module attributes {stable_mosaic.version = 11 : i64} {
  func.func @_fused_kernel(%arg0: i32, %arg1: i32, %arg2: memref<1x8x32xf32, #tpu.memory_space<vmem>>, %arg3: memref<1x8x32xf32, #tpu.memory_space<vmem>>, %arg4: memref<1x8x32xf32, #tpu.memory_space<vmem>>, %arg5: memref<1x8x32xf32, #tpu.memory_space<vmem>>, %arg6: memref<1x8x8xi8, #tpu.memory_space<vmem>>, %arg7: memref<32x32xbf16, #tpu.memory_space<vmem>>, %arg8: memref<32x32xbf16, #tpu.memory_space<vmem>>, %arg9: memref<32x32xbf16, #tpu.memory_space<vmem>>, %arg10: memref<1x8x32xf32, #tpu.memory_space<vmem>>, %arg11: memref<8x32xbf16, #tpu.memory_space<vmem>>, %arg12: memref<8x32xf32, #tpu.memory_space<vmem>>) attributes {dimension_semantics = [#tpu.dimension_semantics<parallel>, #tpu.dimension_semantics<arbitrary>], iteration_bounds = array<i64: 2, 1>, scalar_prefetch = 0 : i64, scratch_operands = 2 : i64, tpu.core_type = #tpu.core_type<tc>, window_params = [{transform_indices = @transform_0, window_bounds = array<i64: 1, 8, 32>}, {transform_indices = @transform_1, window_bounds = array<i64: 1, 8, 32>}, {transform_indices = @transform_2, window_bounds = array<i64: 1, 8, 32>}, {transform_indices = @transform_3, window_bounds = array<i64: 1, 8, 32>}, {transform_indices = @transform_4, window_bounds = array<i64: 1, 8, 8>}, {pipeline_mode = #tpu.pipeline_mode<synchronous>, transform_indices = @transform_5, window_bounds = array<i64: 32, 32>}, {pipeline_mode = #tpu.pipeline_mode<synchronous>, transform_indices = @transform_6, window_bounds = array<i64: 32, 32>}, {pipeline_mode = #tpu.pipeline_mode<synchronous>, transform_indices = @transform_7, window_bounds = array<i64: 32, 32>}, {transform_indices = @transform_8, window_bounds = array<i64: 1, 8, 32>}]} {
    %c0_i32 = arith.constant 0 : i32
    %0 = arith.cmpi eq, %arg1, %c0_i32 : i32
    %1 = arith.extui %0 : i1 to i32
    %c0_i32_0 = arith.constant 0 : i32
    %2 = arith.cmpi ne, %1, %c0_i32_0 : i32
    scf.if %2 {
      %c0_56 = arith.constant 0 : index
      %c0_57 = arith.constant 0 : index
      %c0_58 = arith.constant 0 : index
      %124 = vector.load %arg3[%c0_56, %c0_57, %c0_58] : memref<1x8x32xf32, #tpu.memory_space<vmem>>, vector<1x8x32xf32>
      %125 = vector.shape_cast %124 : vector<1x8x32xf32> to vector<8x32xf32>
      %126 = arith.truncf %125 : vector<8x32xf32> to vector<8x32xbf16>
      %c0_59 = arith.constant 0 : index
      %c0_60 = arith.constant 0 : index
      %127 = vector.load %arg8[%c0_59, %c0_60] : memref<32x32xbf16, #tpu.memory_space<vmem>>, vector<32x32xbf16>
      %cst_61 = arith.constant dense<0.000000e+00> : vector<8x32xf32>
      %128 = tpu.matmul %126, %127, %cst_61 {dimension_numbers = #tpu.dot_dimension_numbers<[1], [1], [0], [0], [0, 0, 1, 0], [], []>} : vector<8x32xbf16>, vector<32x32xbf16>, vector<8x32xf32> -> vector<8x32xf32>
      %129 = arith.truncf %128 : vector<8x32xf32> to vector<8x32xbf16>
      %c0_62 = arith.constant 0 : index
      %c0_63 = arith.constant 0 : index
      %130 = vector.load %arg11[%c0_62, %c0_63] : memref<8x32xbf16, #tpu.memory_space<vmem>>, vector<8x32xbf16>
      tpu.vector_store %arg11[%c0_62, %c0_63], %129 {strides = array<i32>} : memref<8x32xbf16, #tpu.memory_space<vmem>>, vector<8x32xbf16>,
    } else {
    }
    %c0 = arith.constant 0 : index
    %c0_1 = arith.constant 0 : index
    %c0_2 = arith.constant 0 : index
    %3 = vector.load %arg2[%c0, %c0_1, %c0_2] : memref<1x8x32xf32, #tpu.memory_space<vmem>>, vector<1x8x32xf32>
    %4 = vector.shape_cast %3 : vector<1x8x32xf32> to vector<8x32xf32>
    %5 = arith.truncf %4 : vector<8x32xf32> to vector<8x32xbf16>
    %c0_3 = arith.constant 0 : index
    %c0_4 = arith.constant 0 : index
    %6 = vector.load %arg7[%c0_3, %c0_4] : memref<32x32xbf16, #tpu.memory_space<vmem>>, vector<32x32xbf16>
    %cst = arith.constant dense<0.000000e+00> : vector<8x32xf32>
    %7 = tpu.matmul %5, %6, %cst {dimension_numbers = #tpu.dot_dimension_numbers<[1], [1], [0], [0], [0, 0, 1, 0], [], []>} : vector<8x32xbf16>, vector<32x32xbf16>, vector<8x32xf32> -> vector<8x32xf32>
    %cst_5 = arith.constant 0.353553385 : f32
    %8 = vector.broadcast %cst_5 : f32 to vector<8x32xf32>
    %9 = arith.mulf %7, %8 : vector<8x32xf32>
    %10 = arith.truncf %9 : vector<8x32xf32> to vector<8x32xbf16>
    %c0_6 = arith.constant 0 : index
    %c0_7 = arith.constant 0 : index
    %11 = vector.load %arg11[%c0_6, %c0_7] : memref<8x32xbf16, #tpu.memory_space<vmem>>, vector<8x32xbf16>
    %c0_8 = arith.constant 0 : index
    %c0_9 = arith.constant 0 : index
    %c0_10 = arith.constant 0 : index
    %12 = vector.load %arg4[%c0_8, %c0_9, %c0_10] : memref<1x8x32xf32, #tpu.memory_space<vmem>>, vector<1x8x32xf32>
    %13 = vector.shape_cast %12 : vector<1x8x32xf32> to vector<8x32xf32>
    %14 = arith.truncf %13 : vector<8x32xf32> to vector<8x32xbf16>
    %c0_11 = arith.constant 0 : index
    %c0_12 = arith.constant 0 : index
    %c0_13 = arith.constant 0 : index
    %15 = vector.load %arg6[%c0_11, %c0_12, %c0_13] : memref<1x8x8xi8, #tpu.memory_space<vmem>>, vector<1x8x8xi8>
    %16 = vector.shape_cast %15 : vector<1x8x8xi8> to vector<8x8xi8>
    %17 = arith.sitofp %16 : vector<8x8xi8> to vector<8x8xf32>
    %cst_14 = arith.constant 0.000000e+00 : f32
    %18 = vector.broadcast %cst_14 : f32 to vector<8x8xf32>
    %19 = arith.cmpf one, %17, %18 : vector<8x8xf32>
    %20 = vector.extract_strided_slice %10 {offsets = [0, 0], sizes = [8, 8], strides = [1, 1]} : vector<8x32xbf16> to vector<8x8xbf16>
    %21 = vector.extract_strided_slice %11 {offsets = [0, 0], sizes = [8, 8], strides = [1, 1]} : vector<8x32xbf16> to vector<8x8xbf16>
    %22 = vector.extract_strided_slice %14 {offsets = [0, 0], sizes = [8, 8], strides = [1, 1]} : vector<8x32xbf16> to vector<8x8xbf16>
    %cst_15 = arith.constant dense<0.000000e+00> : vector<8x8xf32>
    %23 = tpu.matmul %20, %21, %cst_15 {dimension_numbers = #tpu.dot_dimension_numbers<[1], [1], [0], [0], [0, 0, 1, 0], [], []>} : vector<8x8xbf16>, vector<8x8xbf16>, vector<8x8xf32> -> vector<8x8xf32>
    %cst_16 = arith.constant -1.000000e+04 : f32
    %24 = vector.broadcast %cst_16 : f32 to vector<8x8xf32>
    %25 = arith.select %19, %24, %23 : vector<8x8xi1>, vector<8x8xf32>
    %cst_17 = arith.constant dense<0xFF800000> : vector<8xf32>
    %26 = vector.multi_reduction <maximumf>, %25, %cst_17 [1] : vector<8x8xf32> to vector<8xf32>
    %27 = vector.shape_cast %26 : vector<8xf32> to vector<8x1xf32>
    %28 = vector.broadcast %27 : vector<8x1xf32> to vector<8x8xf32>
    %29 = arith.subf %25, %28 : vector<8x8xf32>
    %30 = math.exp %29 : vector<8x8xf32>
    %cst_18 = arith.constant dense<0.000000e+00> : vector<8xf32>
    %31 = vector.multi_reduction <add>, %30, %cst_18 [1] : vector<8x8xf32> to vector<8xf32>
    %32 = vector.shape_cast %31 : vector<8xf32> to vector<8x1xf32>
    %33 = arith.truncf %30 : vector<8x8xf32> to vector<8x8xbf16>
    %cst_19 = arith.constant dense<0.000000e+00> : vector<8x8xf32>
    %34 = tpu.matmul %33, %22, %cst_19 {dimension_numbers = #tpu.dot_dimension_numbers<[1], [0], [0], [1], [0, 0, 1, 1], [], []>} : vector<8x8xbf16>, vector<8x8xbf16>, vector<8x8xf32> -> vector<8x8xf32>
    %35 = tpu.reciprocal %32 {approx = true} : vector<8x1xf32> -> vector<8x1xf32>
    %36 = vector.broadcast %35 : vector<8x1xf32> to vector<8x8xf32>
    %37 = arith.mulf %34, %36 : vector<8x8xf32>
    %c0_20 = arith.constant 0 : index
    %c0_21 = arith.constant 0 : index
    %38 = vector.load %arg12[%c0_20, %c0_21] : memref<8x32xf32, #tpu.memory_space<vmem>>, vector<8x8xf32>
    tpu.vector_store %arg12[%c0_20, %c0_21], %37 {strides = array<i32>} : memref<8x32xf32, #tpu.memory_space<vmem>>, vector<8x8xf32>,
    %39 = vector.extract_strided_slice %10 {offsets = [0, 8], sizes = [8, 8], strides = [1, 1]} : vector<8x32xbf16> to vector<8x8xbf16>
    %40 = vector.extract_strided_slice %11 {offsets = [0, 8], sizes = [8, 8], strides = [1, 1]} : vector<8x32xbf16> to vector<8x8xbf16>
    %41 = vector.extract_strided_slice %14 {offsets = [0, 8], sizes = [8, 8], strides = [1, 1]} : vector<8x32xbf16> to vector<8x8xbf16>
    %cst_22 = arith.constant dense<0.000000e+00> : vector<8x8xf32>
    %42 = tpu.matmul %39, %40, %cst_22 {dimension_numbers = #tpu.dot_dimension_numbers<[1], [1], [0], [0], [0, 0, 1, 0], [], []>} : vector<8x8xbf16>, vector<8x8xbf16>, vector<8x8xf32> -> vector<8x8xf32>
    %cst_23 = arith.constant -1.000000e+04 : f32
    %43 = vector.broadcast %cst_23 : f32 to vector<8x8xf32>
    %44 = arith.select %19, %43, %42 : vector<8x8xi1>, vector<8x8xf32>
    %cst_24 = arith.constant dense<0xFF800000> : vector<8xf32>
    %45 = vector.multi_reduction <maximumf>, %44, %cst_24 [1] : vector<8x8xf32> to vector<8xf32>
    %46 = vector.shape_cast %45 : vector<8xf32> to vector<8x1xf32>
    %47 = vector.broadcast %46 : vector<8x1xf32> to vector<8x8xf32>
    %48 = arith.subf %44, %47 : vector<8x8xf32>
    %49 = math.exp %48 : vector<8x8xf32>
    %cst_25 = arith.constant dense<0.000000e+00> : vector<8xf32>
    %50 = vector.multi_reduction <add>, %49, %cst_25 [1] : vector<8x8xf32> to vector<8xf32>
    %51 = vector.shape_cast %50 : vector<8xf32> to vector<8x1xf32>
    %52 = arith.truncf %49 : vector<8x8xf32> to vector<8x8xbf16>
    %cst_26 = arith.constant dense<0.000000e+00> : vector<8x8xf32>
    %53 = tpu.matmul %52, %41, %cst_26 {dimension_numbers = #tpu.dot_dimension_numbers<[1], [0], [0], [1], [0, 0, 1, 1], [], []>} : vector<8x8xbf16>, vector<8x8xbf16>, vector<8x8xf32> -> vector<8x8xf32>
    %54 = tpu.reciprocal %51 {approx = true} : vector<8x1xf32> -> vector<8x1xf32>
    %55 = vector.broadcast %54 : vector<8x1xf32> to vector<8x8xf32>
    %56 = arith.mulf %53, %55 : vector<8x8xf32>
    %c0_27 = arith.constant 0 : index
    %c8 = arith.constant 8 : index
    %57 = vector.load %arg12[%c0_27, %c8] : memref<8x32xf32, #tpu.memory_space<vmem>>, vector<8x8xf32>
    tpu.vector_store %arg12[%c0_27, %c8], %56 {strides = array<i32>} : memref<8x32xf32, #tpu.memory_space<vmem>>, vector<8x8xf32>,
    %58 = vector.extract_strided_slice %10 {offsets = [0, 16], sizes = [8, 8], strides = [1, 1]} : vector<8x32xbf16> to vector<8x8xbf16>
    %59 = vector.extract_strided_slice %11 {offsets = [0, 16], sizes = [8, 8], strides = [1, 1]} : vector<8x32xbf16> to vector<8x8xbf16>
    %60 = vector.extract_strided_slice %14 {offsets = [0, 16], sizes = [8, 8], strides = [1, 1]} : vector<8x32xbf16> to vector<8x8xbf16>
    %cst_28 = arith.constant dense<0.000000e+00> : vector<8x8xf32>
    %61 = tpu.matmul %58, %59, %cst_28 {dimension_numbers = #tpu.dot_dimension_numbers<[1], [1], [0], [0], [0, 0, 1, 0], [], []>} : vector<8x8xbf16>, vector<8x8xbf16>, vector<8x8xf32> -> vector<8x8xf32>
    %cst_29 = arith.constant -1.000000e+04 : f32
    %62 = vector.broadcast %cst_29 : f32 to vector<8x8xf32>
    %63 = arith.select %19, %62, %61 : vector<8x8xi1>, vector<8x8xf32>
    %cst_30 = arith.constant dense<0xFF800000> : vector<8xf32>
    %64 = vector.multi_reduction <maximumf>, %63, %cst_30 [1] : vector<8x8xf32> to vector<8xf32>
    %65 = vector.shape_cast %64 : vector<8xf32> to vector<8x1xf32>
    %66 = vector.broadcast %65 : vector<8x1xf32> to vector<8x8xf32>
    %67 = arith.subf %63, %66 : vector<8x8xf32>
    %68 = math.exp %67 : vector<8x8xf32>
    %cst_31 = arith.constant dense<0.000000e+00> : vector<8xf32>
    %69 = vector.multi_reduction <add>, %68, %cst_31 [1] : vector<8x8xf32> to vector<8xf32>
    %70 = vector.shape_cast %69 : vector<8xf32> to vector<8x1xf32>
    %71 = arith.truncf %68 : vector<8x8xf32> to vector<8x8xbf16>
    %cst_32 = arith.constant dense<0.000000e+00> : vector<8x8xf32>
    %72 = tpu.matmul %71, %60, %cst_32 {dimension_numbers = #tpu.dot_dimension_numbers<[1], [0], [0], [1], [0, 0, 1, 1], [], []>} : vector<8x8xbf16>, vector<8x8xbf16>, vector<8x8xf32> -> vector<8x8xf32>
    %73 = tpu.reciprocal %70 {approx = true} : vector<8x1xf32> -> vector<8x1xf32>
    %74 = vector.broadcast %73 : vector<8x1xf32> to vector<8x8xf32>
    %75 = arith.mulf %72, %74 : vector<8x8xf32>
    %c0_33 = arith.constant 0 : index
    %c16 = arith.constant 16 : index
    %76 = vector.load %arg12[%c0_33, %c16] : memref<8x32xf32, #tpu.memory_space<vmem>>, vector<8x8xf32>
    tpu.vector_store %arg12[%c0_33, %c16], %75 {strides = array<i32>} : memref<8x32xf32, #tpu.memory_space<vmem>>, vector<8x8xf32>,
    %77 = vector.extract_strided_slice %10 {offsets = [0, 24], sizes = [8, 8], strides = [1, 1]} : vector<8x32xbf16> to vector<8x8xbf16>
    %78 = vector.extract_strided_slice %11 {offsets = [0, 24], sizes = [8, 8], strides = [1, 1]} : vector<8x32xbf16> to vector<8x8xbf16>
    %79 = vector.extract_strided_slice %14 {offsets = [0, 24], sizes = [8, 8], strides = [1, 1]} : vector<8x32xbf16> to vector<8x8xbf16>
    %cst_34 = arith.constant dense<0.000000e+00> : vector<8x8xf32>
    %80 = tpu.matmul %77, %78, %cst_34 {dimension_numbers = #tpu.dot_dimension_numbers<[1], [1], [0], [0], [0, 0, 1, 0], [], []>} : vector<8x8xbf16>, vector<8x8xbf16>, vector<8x8xf32> -> vector<8x8xf32>
    %cst_35 = arith.constant -1.000000e+04 : f32
    %81 = vector.broadcast %cst_35 : f32 to vector<8x8xf32>
    %82 = arith.select %19, %81, %80 : vector<8x8xi1>, vector<8x8xf32>
    %cst_36 = arith.constant dense<0xFF800000> : vector<8xf32>
    %83 = vector.multi_reduction <maximumf>, %82, %cst_36 [1] : vector<8x8xf32> to vector<8xf32>
    %84 = vector.shape_cast %83 : vector<8xf32> to vector<8x1xf32>
    %85 = vector.broadcast %84 : vector<8x1xf32> to vector<8x8xf32>
    %86 = arith.subf %82, %85 : vector<8x8xf32>
    %87 = math.exp %86 : vector<8x8xf32>
    %cst_37 = arith.constant dense<0.000000e+00> : vector<8xf32>
    %88 = vector.multi_reduction <add>, %87, %cst_37 [1] : vector<8x8xf32> to vector<8xf32>
    %89 = vector.shape_cast %88 : vector<8xf32> to vector<8x1xf32>
    %90 = arith.truncf %87 : vector<8x8xf32> to vector<8x8xbf16>
    %cst_38 = arith.constant dense<0.000000e+00> : vector<8x8xf32>
    %91 = tpu.matmul %90, %79, %cst_38 {dimension_numbers = #tpu.dot_dimension_numbers<[1], [0], [0], [1], [0, 0, 1, 1], [], []>} : vector<8x8xbf16>, vector<8x8xbf16>, vector<8x8xf32> -> vector<8x8xf32>
    %92 = tpu.reciprocal %89 {approx = true} : vector<8x1xf32> -> vector<8x1xf32>
    %93 = vector.broadcast %92 : vector<8x1xf32> to vector<8x8xf32>
    %94 = arith.mulf %91, %93 : vector<8x8xf32>
    %c0_39 = arith.constant 0 : index
    %c24 = arith.constant 24 : index
    %95 = vector.load %arg12[%c0_39, %c24] : memref<8x32xf32, #tpu.memory_space<vmem>>, vector<8x8xf32>
    tpu.vector_store %arg12[%c0_39, %c24], %94 {strides = array<i32>} : memref<8x32xf32, #tpu.memory_space<vmem>>, vector<8x8xf32>,
    %c0_40 = arith.constant 0 : index
    %c0_41 = arith.constant 0 : index
    %96 = vector.load %arg12[%c0_40, %c0_41] : memref<8x32xf32, #tpu.memory_space<vmem>>, vector<8x32xf32>
    %97 = arith.truncf %96 : vector<8x32xf32> to vector<8x32xbf16>
    %c0_42 = arith.constant 0 : index
    %c0_43 = arith.constant 0 : index
    %98 = vector.load %arg9[%c0_42, %c0_43] : memref<32x32xbf16, #tpu.memory_space<vmem>>, vector<32x32xbf16>
    %cst_44 = arith.constant dense<0.000000e+00> : vector<8x32xf32>
    %99 = tpu.matmul %97, %98, %cst_44 {dimension_numbers = #tpu.dot_dimension_numbers<[1], [1], [0], [0], [0, 0, 1, 0], [], []>} : vector<8x32xbf16>, vector<32x32xbf16>, vector<8x32xf32> -> vector<8x32xf32>
    %c0_45 = arith.constant 0 : index
    %c0_46 = arith.constant 0 : index
    %c0_47 = arith.constant 0 : index
    %100 = vector.load %arg5[%c0_45, %c0_46, %c0_47] : memref<1x8x32xf32, #tpu.memory_space<vmem>>, vector<1x8x32xf32>
    %101 = vector.shape_cast %100 : vector<1x8x32xf32> to vector<8x32xf32>
    %102 = arith.addf %99, %101 : vector<8x32xf32>
    %cst_48 = arith.constant dense<0.000000e+00> : vector<8xf32>
    %103 = vector.multi_reduction <add>, %102, %cst_48 [1] : vector<8x32xf32> to vector<8xf32>
    %104 = vector.shape_cast %103 : vector<8xf32> to vector<8x1xf32>
    %cst_49 = arith.constant 3.200000e+01 : f32
    %105 = vector.broadcast %cst_49 : f32 to vector<8x1xf32>
    %106 = arith.divf %104, %105 : vector<8x1xf32>
    %107 = arith.mulf %102, %102 : vector<8x32xf32>
    %cst_50 = arith.constant dense<0.000000e+00> : vector<8xf32>
    %108 = vector.multi_reduction <add>, %107, %cst_50 [1] : vector<8x32xf32> to vector<8xf32>
    %109 = vector.shape_cast %108 : vector<8xf32> to vector<8x1xf32>
    %cst_51 = arith.constant 3.200000e+01 : f32
    %110 = vector.broadcast %cst_51 : f32 to vector<8x1xf32>
    %111 = arith.divf %109, %110 : vector<8x1xf32>
    %112 = arith.mulf %106, %106 : vector<8x1xf32>
    %113 = arith.subf %111, %112 : vector<8x1xf32>
    %114 = vector.broadcast %106 : vector<8x1xf32> to vector<8x32xf32>
    %115 = arith.subf %102, %114 : vector<8x32xf32>
    %cst_52 = arith.constant 9.99999974E-6 : f32
    %116 = vector.broadcast %cst_52 : f32 to vector<8x1xf32>
    %117 = arith.addf %113, %116 : vector<8x1xf32>
    %118 = math.rsqrt %117 : vector<8x1xf32>
    %119 = vector.broadcast %118 : vector<8x1xf32> to vector<8x32xf32>
    %120 = arith.mulf %115, %119 : vector<8x32xf32>
    %c0_53 = arith.constant 0 : index
    %c0_54 = arith.constant 0 : index
    %c0_55 = arith.constant 0 : index
    %121 = vector.load %arg10[%c0_53, %c0_54, %c0_55] : memref<1x8x32xf32, #tpu.memory_space<vmem>>, vector<1x8x32xf32>
    %122 = vector.shape_cast %121 : vector<1x8x32xf32> to vector<8x32xf32>
    %123 = vector.shape_cast %120 : vector<8x32xf32> to vector<1x8x32xf32>
    tpu.vector_store %arg10[%c0_53, %c0_54, %c0_55], %123 {strides = array<i32>} : memref<1x8x32xf32, #tpu.memory_space<vmem>>, vector<1x8x32xf32>,
    return
  }
  func.func @transform_0(%arg0: i32, %arg1: i32) -> (i32, i32, i32) {
    %c0_i32 = arith.constant 0 : i32
    %c0_i32_0 = arith.constant 0 : i32
    return %arg0, %arg1, %c0_i32 : i32, i32, i32
  }
  func.func @transform_1(%arg0: i32, %arg1: i32) -> (i32, i32, i32) {
    %c0_i32 = arith.constant 0 : i32
    %c0_i32_0 = arith.constant 0 : i32
    %c0_i32_1 = arith.constant 0 : i32
    return %arg0, %c0_i32, %c0_i32_0 : i32, i32, i32
  }
  func.func @transform_2(%arg0: i32, %arg1: i32) -> (i32, i32, i32) {
    %c0_i32 = arith.constant 0 : i32
    %c0_i32_0 = arith.constant 0 : i32
    %c0_i32_1 = arith.constant 0 : i32
    return %arg0, %c0_i32, %c0_i32_0 : i32, i32, i32
  }
  func.func @transform_3(%arg0: i32, %arg1: i32) -> (i32, i32, i32) {
    %c0_i32 = arith.constant 0 : i32
    %c0_i32_0 = arith.constant 0 : i32
    return %arg0, %arg1, %c0_i32 : i32, i32, i32
  }
  func.func @transform_4(%arg0: i32, %arg1: i32) -> (i32, i32, i32) {
    %c0_i32 = arith.constant 0 : i32
    %c0_i32_0 = arith.constant 0 : i32
    return %arg0, %arg1, %c0_i32 : i32, i32, i32
  }
  func.func @transform_5(%arg0: i32, %arg1: i32) -> (i32, i32) {
    %c0_i32 = arith.constant 0 : i32
    %c0_i32_0 = arith.constant 0 : i32
    %c0_i32_1 = arith.constant 0 : i32
    return %c0_i32, %c0_i32_0 : i32, i32
  }
  func.func @transform_6(%arg0: i32, %arg1: i32) -> (i32, i32) {
    %c0_i32 = arith.constant 0 : i32
    %c0_i32_0 = arith.constant 0 : i32
    %c0_i32_1 = arith.constant 0 : i32
    return %c0_i32, %c0_i32_0 : i32, i32
  }
  func.func @transform_7(%arg0: i32, %arg1: i32) -> (i32, i32) {
    %c0_i32 = arith.constant 0 : i32
    %c0_i32_0 = arith.constant 0 : i32
    %c0_i32_1 = arith.constant 0 : i32
    return %c0_i32, %c0_i32_0 : i32, i32
  }
  func.func @transform_8(%arg0: i32, %arg1: i32) -> (i32, i32, i32) {
    %c0_i32 = arith.constant 0 : i32
    %c0_i32_0 = arith.constant 0 : i32
    return %arg0, %arg1, %c0_i32 : i32, i32, i32
  }
}

</mosaic_0001>

<bundles_post_ra>
// kernel: tpu_custom_call.1
= control target key start
LH: loop header
LB: loop body
LE: loop exit
PB: predicated region body
PF: predicated region fallthrough
CT: control target
= control target key end

     0   :  { %s2086_s0 = inlined_call_operand.hbm [shape: f32[2,8,32], index: 0, kind: input, shape index: {}]   ;;  %s2087_s1 = inlined_call_operand.hbm [shape: f32[2,8,32], index: 1, kind: input, shape index: {}]   ;;  %s2088_s2 = inlined_call_operand.hbm [shape: f32[2,8,32], index: 2, kind: input, shape index: {}]   ;;  %s2089_s3 = inlined_call_operand.hbm [shape: f32[2,8,32], index: 3, kind: input, shape index: {}]   ;;  %s2090_s4 = inlined_call_operand.hbm [shape: s8[2,8,8], index: 4, kind: input, shape index: {}]   ;;  %s2091_s5 = inlined_call_operand.hbm [shape: bf16[32,32], index: 5, kind: input, shape index: {}]   ;;  %s2092_s6 = inlined_call_operand.hbm [shape: bf16[32,32], index: 6, kind: input, shape index: {}]   ;;  %s2093_s7 = inlined_call_operand.hbm [shape: bf16[32,32], index: 7, kind: input, shape index: {}]   ;;  %s2094_s8 = inlined_call_operand.hbm [shape: f32[2,8,32], index: 8, kind: output, shape index: {}]  }
   0x1   :  { %2108 = sst [smem:[#allocation32_spill]] %s2086_s0 }
   0x2   :  { %2109 = sst [smem:[#allocation33_spill]] %s2087_s1 }
   0x3   :  { %2110 = sst [smem:[#allocation34_spill]] %s2089_s3 }
   0x4   :  { %2111 = sst [smem:[#allocation35_spill]] %s2091_s5 }
   0x5   :  { %2112 = sst [smem:[#allocation36_spill]] %s2094_s8 }
   0x6   :  { %13 = vsyncpa [#allocation5], 0 }
   0x7   :  { %15 = vsyncpa [#allocation5 + $0x1], 0 }
   0x8   :  { %16 = vsyncpa [#allocation8], 0 }
   0x9   :  { %18 = vsyncpa [#allocation8 + $0x1], 0 }
   0xa   :  { %19 = vsyncpa [#allocation11], 0 }
   0xb   :  { %21 = vsyncpa [#allocation11 + $0x1], 0 }
   0xc   :  { %22 = vsyncpa [#allocation14], 0 }
   0xd   :  { %23 = vsyncpa [#allocation17], 0 }
   0xe   :  { %24 = vsyncpa [#allocation6], 0 }
   0xf   :  { %26 = vsyncpa [#allocation6 + $0x1], 0  ;;  %s1789_s27 = smov 0   ;;  %s1791_s28 = smov 0  }
  0x10   :  { %s1793_s29 = smov 0   ;;  %s1795_s30 = smov 0  }
  0x11   :  { %s1797_s9 = smov 0   ;;  %s1799_s10 = smov 0  }
  0x12 LB: > { %2113 = sst [smem:[#allocation25_spill]] %s1710_s27  ;;  %s1820_s11 = sadd.s32 4294967295, %s1730_s10   ;;  %s1730_s10 = sphi %s1799_s10, %s32_s10   ;;  %s1726_s9 = sphi %s1797_s9, %s2143_s9   ;;  %s1722_s30 = sphi %s1795_s30, %s2142_s30   ;;  %s1718_s29 = sphi %s1793_s29, %s2138_s29   ;;  %s1714_s28 = sphi %s1791_s28, %s2141_s28   ;;  %s1710_s27 = sphi %s1789_s27, %s2140_s27  }
  0x13   : > { %2114 = sst [smem:[#allocation26_spill]] %s1718_s29  ;;  %s1179_s12 = sadd.s32 4294967294, %s1730_s10  }
  0x14   : > { %2115 = sst [smem:[#allocation27_spill]] %s1730_s10  ;;  %p66_p0 = scmp.ne.s32.totalorder %s1714_s28, %s1710_s27 }
  0x15   : > { %p67_p1 = scmp.eq.s32.totalorder %s1820_s11, 0  ;;  %p263_p2 = scmp.eq.s32.totalorder %s1820_s11, 1 }
  0x16   : > { %p269_p3 = scmp.eq.s32.totalorder %s1179_s12, 1  ;;  %p1180_p5 = scmp.ge.s32.totalorder %s1730_s10, 1 }
  0x17   : > { %p1829_p4 = por %p67_p1, %p66_p0  ;;  %p276_p7 = scmp.lt.s32.totalorder %s1730_s10, 3 }
  0x18   : > { %p1834_p6 = por %p269_p3, %p66_p0  ;;  %s2119_s5 = sld [smem:[#allocation35_spill]] }
  0x19   : > { %p1842_p8 = pnand %p1180_p5, %p276_p7  ;;  %s1732_s19 = smov [#allocation13]  }
  0x1a   : > { %s2117_s14 = scalar_select %p1834_p6, 1, 0 }
  0x1b   : > { %p1274_p9 = pneg %p1842_p8  ;;  %s289_s20 = sshll.u32 %s1732_s19, 4  ;;  %s290_s20 = int_to_ptr.vmem [resolvable:$true] %s289_s20 }
  0x1c   : > { %2118 = sst [smem:[#allocation28_spill]] %s2117_s14  ;;  %p1184_p11 = scmp.ge.s32.totalorder %s1730_s10, 2 }
  0x1d   : > { %p1850_p10 = pnand %p1274_p9, %p67_p1  ;;  %s2095_s22 = smov 64  }
  0x1e   : > { %s287_s17 = sshll.u32 %s2119_s5, 4  ;;  %s2097_s23 = smov 4   ;;  %s288_s17 = int_to_ptr.hbm [resolvable:$true] %s287_s17 }
  0x1f   : > { %1277 = dma.hbm_to_vmem [thread:$0]  (!%p1850_p10), %s288_s17, 256, %s290_s20, [#allocation14], %s2095_s22, %s2095_s22, %s2097_s23  }
  0x20   : > { %s44_s24 = sadd.s32 1, %s1726_s9  ;;  %s53_s25 = sadd.s32 1, %s1718_s29 }
  0x21   : > { %p46_p12 = scmp.ge.s32.totalorder %s44_s24, 2  ;;  %p60_p13 = scmp.ne.s32.totalorder %s1718_s29, %s1714_s28 }
  0x22   : > { %p61_p0 = scmp.eq.s32.totalorder %s1730_s10, 0  ;;  %p1307_p7 = scmp.lt.s32.totalorder %s1730_s10, 2 }
  0x23   : > { %s2145_s24 = smov (%p46_p12, %s44_s24), 0  ;;  %p1869_p5 = por %p263_p2, %p60_p13 }
  0x24   : > { %2122 = sst [smem:[#allocation29_spill]] %s2145_s24  ;;  %p62_p3 = por %p61_p0, %p60_p13 }
  0x25   : > { %s2123_s26 = scalar_select %p1869_p5, 1, 0 }
  0x26   : > { %s48_s12 = ssub.s32 %s1726_s9, %s2145_s24  ;;  %s1877_s15 = sand.u32 1, %s1718_s29  }
  0x27   : > { %2124 = sst [smem:[#allocation30_spill]] %s2123_s26  ;;  %p51_p9 = scmp.eq.s32.totalorder %s48_s12, 0 }
  0x28   : > { %s1880_s16 = sshll.u32 %s1877_s15, 3  ;;  %s1883_s17 = sshll.u32 %s1726_s9, 3 }
  0x29   : > { %s1886_s19 = scalar_select %p51_p9, %s1718_s29, %s53_s25  }
  0x2a   : > { %p1888_p2 = pnand %p1307_p7, %p62_p3  ;;  %s351_s22 = sand.u32 1, %s1730_s10  }
  0x2b   : > { %2125 = sst [smem:[#allocation31_spill]] %s1886_s19  ;;  %s355_s14 = scalar_lea.vmem [#allocation7], %s1880_s16 }
  0x2c   : > { %s2127_s1 = sld [smem:[#allocation33_spill]]  ;;  %s363_s27 = sshll.u32 %s355_s14, 4  ;;  %s364_s27 = int_to_ptr.vmem [resolvable:$true] %s363_s27 }
  0x2d   : > { %s1898_s26 = scalar_lea.sflag [#allocation8], %s351_s22  ;;  %s2128_s3 = sld [smem:[#allocation34_spill]] }
  0x2e   : > { %s393_s10 = scalar_lea.vmem [#allocation10], %s1880_s16  ;;  %s301_s12 = sshll.u32 %s2092_s6, 4  ;;  %s302_s12 = int_to_ptr.hbm [resolvable:$true] %s301_s12 }
  0x2f   : > { %s402_s8 = sshll.u32 %s393_s10, 4  ;;  %s315_s19 = sshll.u32 %s2093_s7, 4  ;;  %s403_s8 = int_to_ptr.vmem [resolvable:$true] %s402_s8  ;;  %s316_s19 = int_to_ptr.hbm [resolvable:$true] %s315_s19 }
  0x30   : > { %s2129_s25 = smov 4   ;;  %s2131_s0 = sld [smem:[#allocation32_spill]] }
  0x31   : > { %s378_s21 = scalar_lea.hbm %s2088_s2, %s1883_s17  ;;  %s374_s14 = scalar_lea.vmem [#allocation9], %s1880_s16 }
  0x32   : > { %s359_s5 = scalar_lea.hbm %s2127_s1, %s1883_s17  ;;  %s1911_s1 = scalar_lea.sflag [#allocation11], %s351_s22 }
  0x33   : > { %s361_s24 = sshll.u32 %s359_s5, 4  ;;  %s398_s29 = scalar_lea.hbm %s2128_s3, %s1883_s17  ;;  %s362_s24 = int_to_ptr.hbm [resolvable:$true] %s361_s24 }
  0x34   : > { %1290 = dma.hbm_to_vmem [thread:$0]  (!%p1888_p2), %s362_s24, 128, %s364_s27, %s1898_s26  }
  0x35   : > { %s400_s23 = sshll.u32 %s398_s29, 4  ;;  %s1735_s27 = smov [#allocation15]   ;;  %s401_s23 = int_to_ptr.hbm [resolvable:$true] %s400_s23 }
  0x36   : > { %1296 = dma.hbm_to_vmem [thread:$0]  (!%p1888_p2), %s401_s23, 128, %s403_s8, %s1911_s1  }
  0x37   : > { %s303_s24 = sshll.u32 %s1735_s27, 4  ;;  %s2130_s5 = smov 64   ;;  %s304_s24 = int_to_ptr.vmem [resolvable:$true] %s303_s24 }
  0x38   : > { %1280 = dma.hbm_to_vmem [thread:$0]  (!%p1850_p10), %s302_s12, 256, %s304_s24, [#allocation14], %s2130_s5, %s2130_s5, %s2129_s25  }
  0x39   : > { %s1736_s22 = smov [#allocation16]   ;;  %s340_s27 = scalar_lea.hbm %s2131_s0, %s1883_s17 }
  0x3a   : > { %s317_s8 = sshll.u32 %s1736_s22, 4  ;;  %s342_s10 = sshll.u32 %s340_s27, 4  ;;  %s318_s8 = int_to_ptr.vmem [resolvable:$true] %s317_s8  ;;  %s343_s10 = int_to_ptr.hbm [resolvable:$true] %s342_s10 }
  0x3b   : > { %1283 = dma.hbm_to_vmem [thread:$0]  (!%p1850_p10), %s316_s19, 256, %s318_s8, [#allocation17], %s2130_s5, %s2130_s5, %s2129_s25  }
  0x3c   : > { %s335_s29 = scalar_lea.vmem [#allocation4], %s1880_s16  ;;  %s332_s12 = scalar_lea.sflag [#allocation5], %s1877_s15 }
  0x3d   : > { %s344_s3 = sshll.u32 %s335_s29, 4  ;;  %s380_s23 = sshll.u32 %s378_s21, 4  ;;  %s345_s3 = int_to_ptr.vmem [resolvable:$true] %s344_s3  ;;  %s381_s23 = int_to_ptr.hbm [resolvable:$true] %s380_s23 }
  0x3e   : > { %1287 = dma.hbm_to_vmem [thread:$0]  (!%p1888_p2), %s343_s10, 128, %s345_s3, %s332_s12  }
  0x3f   : > { %s382_s0 = sshll.u32 %s374_s14, 4  ;;  %s1193_s19 = sshll.u32 %s1877_s15, 1  ;;  %s383_s0 = int_to_ptr.vmem [resolvable:$true] %s382_s0 }
  0x40   : > { %1293 = dma.hbm_to_vmem [thread:$0]  (!%p1888_p2), %s381_s23, 128, %s383_s0, %s1898_s26  }
  0x41   : > { %s1194_s25 = sshll.u32 %s1726_s9, 1  ;;  %s413_s10 = scalar_lea.vmem [#allocation12], %s1193_s19 }
  0x42   : > { %s418_s27 = scalar_lea.hbm %s2090_s4, %s1194_s25  ;;  %s422_s29 = sshll.u32 %s413_s10, 4  ;;  %s423_s29 = int_to_ptr.vmem [resolvable:$true] %s422_s29 }
  0x43   : > { %s420_s3 = sshll.u32 %s418_s27, 4  ;;  %431 = sbr.rel (%p1842_p8) target bundleno = 1343 (0x53f), region = 52  ;;  %s421_s3 = int_to_ptr.hbm [resolvable:$true] %s420_s3 }
  0x44   : > { %1299 = dma.hbm_to_vmem [thread:$0]  (!%p1888_p2), %s421_s3, 32, %s423_s29, %s1911_s1  }
  0x45   : > { %s1956_s16 = sand.u32 (!%p1842_p8), 1, %s1714_s28  }
  0x46   : > { %s1959_s0 = sshll.u32 (!%p1842_p8), %s1956_s16, 3  ;;  %s434_s26 = scalar_lea.sflag (!%p1842_p8), [#allocation5], %s1956_s16 }
  0x47   : > { %s437_s15 = scalar_lea.vmem (!%p1842_p8), [#allocation4], %s1959_s0 }
  0x48   : > { %1685 = dma.done.wait (%p1829_p4), %s434_s26, 128  }
  0x49   : > { %1687 = vsyncadd (%p1829_p4), %s434_s26, 4294967168  ;;  %s443_s1 = sand.u32 1, %s1820_s11   ;;  %s447_s17 = scalar_lea.vmem [#allocation7], %s1959_s0 }
  0x4a   : > { %s444_s18 = scalar_lea.sflag [#allocation8], %s443_s1 }
  0x4b   : > { %1689 = dma.done.wait (%p1829_p4), %s444_s18, 256  }
  0x4c   : > { %1691 = vsyncadd (%p1829_p4), %s444_s18, 4294967040  ;;  %s457_s20 = scalar_lea.vmem [#allocation9], %s1959_s0  ;;  %s464_s12 = scalar_lea.sflag [#allocation11], %s443_s1 }
  0x4d   : > { %s467_s24 = scalar_lea.vmem [#allocation10], %s1959_s0 }
  0x4e   : > { %1693 = dma.done.wait (%p1829_p4), %s464_s12, 160  }
  0x4f   : > { %1695 = vsyncadd (%p1829_p4), %s464_s12, 4294967136  ;;  %s1200_s22 = sshll.u32 %s1956_s16, 1 }
  0x50   : > { %s1980_s21 = scalar_lea.vmem [#allocation12], %s1200_s22 }
  0x51   : > { %1697 = dma.done.wait (%p67_p1), [#allocation14], 512  }
  0x52   : > { %1699 = vsyncadd (%p67_p1), [#allocation14], 4294966784 }
  0x53   : > { %1701 = dma.done.wait (%p67_p1), [#allocation17], 256  }
  0x54   : > { %1703 = vsyncadd (%p67_p1), [#allocation17], 4294967040  ;;  %vm567_vm0 = vcmask 261120   ;;  %v1245_v0 = vld [vmem:[#allocation15 + $0x8] sm:$0xff]  ;;  %v1247_v1 = vld [vmem:[#allocation13 + $0x8] sm:$0xff]  ;;  %vm591_vm1 = vcmask 257024  }
  0x55   : > { %v575_v2 = vsel %vm567_vm0, %v1245_v0, 0  ;;  %v617_v3 = vsel %vm567_vm0, %v1247_v1, 0  ;;  %v1244_v4 = vld [vmem:[#allocation15] sm:$0xff]  ;;  %v1246_v5 = vld [vmem:[#allocation13] sm:$0xff]  ;;  %vm641_vm2 = vcmask 64512   ;;  %s1737_s11 = smov 104  }
  0x56   : > { %583 = vmatpush.bf16.xpose.msra.mxu0 %v575_v2  ;;  %625 = vmatpush.bf16.xpose.msra.mxu1 %v617_v3  ;;  %v572_v6 = vsel %vm567_vm0, %v1244_v4, 0  ;;  %v614_v7 = vsel %vm567_vm0, %v1246_v5, 0  ;;  %v551_v8 = vld [vmem:[%s447_s17] sm:$0xff]  ;;  %v593_v9 = vld [vmem:[%s437_s15] sm:$0xff]  ;;  %s1738_s13 = smov 120   ;;  %s1739_s23 = smov 112  }
  0x57   : > { %v552_v10 = vpack.c.bf16 %v551_v8, %v551_v8  ;;  %v594_v11 = vpack.c.bf16 %v593_v9, %v593_v9  ;;  %v637_v30 = vld [vmem:[%s1980_s21] sm:$0x3]  ;;  %vm675_vm4 = vcmask 1043456   ;;  %s1740_s14 = smov 8   ;;  %s1741_s19 = smov 24   ;;  %vm765_vm5 = vcmask 130112  }
  0x58   : > { %v638_v32 = vunpack.c.0.s8 %v637_v30  ;;  %v635_v33 = vld [vmem:[%s457_s20] sm:$0xff]  ;;  %s1742_s25 = smov 16   ;;  %vm828_vm6 = vcmask 195712   ;;  %vm891_vm7 = vcmask 261312   ;;  %s1241_s5 = sshll.u32 %s1722_s30, 3 }
  0x59   : > { %v636_v34 = vpack.c.bf16 %v635_v33, %v635_v33  ;;  %s2132_s3 = sld [smem:[#allocation36_spill]]  ;;  %s545_s26 = scalar_lea.vmem [#allocation18], %s1959_s0 }
  0x5a   : > { %v639_v35 = vcvt.s32.f32 %v638_v32  ;;  %s978_s15 = sshll.u32 %s545_s26, 4  ;;  %s965_s30 = scalar_lea.sflag [#allocation6], %s1956_s16  ;;  %s979_s15 = int_to_ptr.vmem [resolvable:$true] %s978_s15 }
  0x5b   : > { %v736_v36 = vunpack.c.l.b16 %v636_v34  ;;  %v677_v42 = vsel %vm675_vm4, %v636_v34, 0 }
  0x5c   : > { %vm640_vm3 = vcmp.ne.f32.partialorder %v639_v35, 0.0  ;;  %686 = vmatpush.bf16.msra.mxu3 %v677_v42 }
  0x5d   : > { %v737_v37 = vpack.c.b16 %v736_v36, %v736_v36 }
  0x5e   : > { %584 = vmatpush.bf16.xpose.msra.mxu0 %v572_v6  ;;  %626 = vmatpush.bf16.xpose.msra.mxu1 %v614_v7 }
  0x5f   : > { %s976_s10 = scalar_lea.hbm %s2132_s3, %s1241_s5  ;;  %s1652_s12 = scalar_lea.hbm %s2132_s3, 16 }
  0x60   : > { %s980_s1 = sshll.u32 %s976_s10, 4  ;;  %s981_s1 = int_to_ptr.hbm [resolvable:$true] %s980_s1 }
  0x61   : > { %s1646_s18 = sshra.s32 %s981_s1, 4  ;;  %s1647_s18 = int_to_ptr.hbm [resolvable:$true] %s1646_s18 }
  0x62   : > { %s1648_s17 = scalar_lea.hbm %s1647_s18, 8  ;;  %p1653_p10 = scmp.lt.s32.totalorder %s1647_s18, %s2132_s3 }
  0x63   : > { %p1649_p1 = scmp.ne.s32.totalorder %s1647_s18, %s1648_s17  ;;  %p1654_p12 = scmp.lt.s32.totalorder %s1652_s12, %s1648_s17 }
  0x65   : > { %1213 = vmatmul.msk.bf16.vlgmr.msra.gmra.mxu0 %vm567_vm0, %v552_v10  ;;  %1222 = vmatmul.msk.bf16.vlgmr.msra.gmra.mxu1 %vm567_vm0, %v594_v11  ;;  %p1650_p4 = pnand %p1649_p1, %p1869_p5  ;;  %p1655_p13 = por %p1654_p12, %p1653_p10 }
  0x67   : > { %p1651_p8 = pneg %p1650_p4 }
  0x69   : > { %p1656_p0 = pnand %p1655_p13, %p1651_p8 }
  0xe2   : > { %v586_v12 = vpop.f32.mrf.mxu0  ;;  %v628_v13 = vpop.f32.mrf.mxu1 }
  0xe3   : > { %v590_v14 = vpack.c.bf16 %v586_v12, %v586_v12  ;;  %v632_v15 = vmul.f32 0.35355338, %v628_v13 }
  0xe5   : > { %592 = vst.msk [vmem:[#allocation2] sm:$0xf] %vm591_vm1, %v590_v14  ;;  %v633_v16 = vpack.c.bf16 %v632_v15, %v632_v15 }
  0xe7   : > { %v696_v17 = vunpack.c.l.b16 %v633_v16 }
  0xe9   : > { %v697_v18 = vpack.c.b16 %v696_v17, %v696_v17 }
  0xea   : > { %v588_v19 = vpop.f32.mrf.mxu0  ;;  %v630_v20 = vpop.f32.mrf.mxu1 }
  0xeb   : > { %830 = vrot.lane.b32.xlu2 %v697_v18, %s1737_s11  ;;  %698 = vrot.lane.b32.xlu1 %v697_v18, %s1738_s13 }
  0xec   : > { %v634_v21 = vld [vmem:[#allocation2] sm:$0xf] }
  0xed   : > { %v646_v22 = vsel %vm641_vm2, %v634_v21, 0  ;;  %v701_v23 = vunpack.c.l.b16 %v634_v21 }
  0xee   : > { %655 = vmatpush.bf16.xpose.msra.mxu2 %v646_v22 }
  0xef   : > { %v702_v24 = vpack.c.b16 %v701_v23, %v701_v23 }
  0xf3   : > { %769 = vrot.lane.b32.xlu2 %v702_v24, %s1739_s23  ;;  %832 = vrot.lane.b32.xlu1 %v702_v24, %s1737_s11 }
  0xf5   : > { %1223 = vmatmul.msk.bf16.vlgmr.msra.gmra.mxu2 %vm641_vm2, %v633_v16 }
  0xfb   : > { %767 = vrot.lane.b32.xlu1 %v697_v18, %s1739_s23 }
 0x103   : > { %738 = vrot.lane.b32.xlu1 %v737_v37, %s1738_s13 }
 0x145   : > { %v831_v25 = vpop.permute.xlu2 %830 }
 0x14d   : > { %v770_v26 = vpop.permute.xlu2 %769 }
 0x14e   : > { %v775_v27 = vsel %vm641_vm2, %v770_v26, 0 }
 0x14f   : > { %784 = vmatpush.bf16.xpose.msrb.mxu0 %v775_v27 }
 0x15d   : > { %v699_v28 = vpop.permute.xlu1 %698 }
 0x165   : > { %v833_v29 = vpop.permute.xlu1 %832 }
 0x166   : > { %v838_v54 = vsel %vm641_vm2, %v833_v29, 0 }
 0x16d   : > { %v768_v31 = vpop.permute.xlu1 %767 }
 0x16e   : > { %1227 = vmatmul.msk.bf16.vlgmr.msrb.gmra.mxu0 %vm641_vm2, %v768_v31 }
 0x175   : > { %v739_v1 = vpop.permute.xlu1 %738 }
 0x176   : > { %v744_v3 = vsel %vm675_vm4, %v739_v1, 0 }
 0x177   : > { %753 = vmatpush.bf16.msrb.mxu2 %v744_v3 }
 0x178   : > { %v657_v38 = vpop.f32.mrf.mxu2 }
 0x179   : > { %v661_v39 = vsel %vm640_vm3, -10000.0, %v657_v38 }
 0x17a   : > { %v662_v40 = vsel %vm641_vm2, %v661_v39, -inf }
 0x17b   : > { %663 = vmax.xlane.f32.xlu0 %v662_v40 }
 0x180   : > { %v659_v41 = vpop.f32.mrf.mxu2 }
 0x18f   : > { %703 = vrot.lane.b32.xlu0 %v702_v24, %s1738_s13 }
 0x1eb   : > { %v786_v43 = vpop.f32.mrf.mxu0 }
 0x1ec   : > { %v790_v44 = vsel %vm640_vm3, -10000.0, %v786_v43 }
 0x1ed   : > { %v791_v45 = vsel %vm641_vm2, %v790_v44, -inf }
 0x1ee   : > { %v664_v46 = vpop.xlane.xlu0 %663  ;;  %792 = vmax.xlane.f32.xlu1 %v791_v45 }
 0x1ef   : > { %v665_v47 = vsub.f32 %v661_v39, %v664_v46  ;;  %v1248_v46 = vld [vmem:[#allocation16] sm:$0xff] }
 0x1f1   : > { %v666_v48 = vmul.f32 1.442695, %v665_v47  ;;  %v914_v47 = vsel %vm567_vm0, %v1248_v46, 0 }
 0x1f3   : > { %1372 = vpow2.f32 %v666_v48  ;;  %v788_v49 = vpop.f32.mrf.mxu0 }
 0x1f9   : > { %v1373_v50 = vpop.eup %1372 }
 0x1fa   : > { %v671_v51 = vpack.c.bf16 %v1373_v50, %v1373_v50  ;;  %v668_v8 = vsel %vm641_vm2, %v1373_v50, 0.0 }
 0x1fc   : > { %1224 = vmatmul.msk.bf16.vlgmr.msra.gmra.mxu3 %vm641_vm2, %v671_v51 }
 0x201   : > { %v704_v52 = vpop.permute.xlu0 %703 }
 0x202   : > { %v709_v53 = vsel %vm641_vm2, %v704_v52, 0 }
 0x203   : > { %718 = vmatpush.bf16.xpose.msrb.mxu3 %v709_v53  ;;  %v899_v53 = vld [vmem:[%s467_s24] sm:$0xff] }
 0x20b   : > { %847 = vmatpush.bf16.xpose.msra.mxu3 %v838_v54 }
 0x20c   : > { %1225 = vmatmul.msk.bf16.vlgmr.msrb.gmra.mxu3 %vm641_vm2, %v699_v28 }
 0x21c   : > { %1229 = vmatmul.msk.bf16.vlgmr.msra.gmra.mxu3 %vm641_vm2, %v831_v25 }
 0x261   : > { %v793_v2 = vpop.xlane.xlu1 %792 }
 0x262   : > { %v794_v4 = vsub.f32 %v790_v44, %v793_v2  ;;  %v1249_v44 = vld [vmem:[#allocation16 + $0x8] sm:$0xff] }
 0x263   : > { %v917_v45 = vsel %vm567_vm0, %v1249_v44, 0 }
 0x264   : > { %v795_v5 = vmul.f32 1.442695, %v794_v4  ;;  %925 = vmatpush.bf16.xpose.msra.mxu0 %v917_v45 }
 0x266   : > { %1374 = vpow2.f32 %v795_v5 }
 0x26c   : > { %v1375_v6 = vpop.eup %1374  ;;  %926 = vmatpush.bf16.xpose.msra.mxu0 %v914_v47 }
 0x26d   : > { %v797_v7 = vsel %vm641_vm2, %v1375_v6, 0.0  ;;  %v800_v25 = vpack.c.bf16 %v1375_v6, %v1375_v6 }
 0x27f   : > { %v688_v55 = vpop.f32.mrf.mxu3 }
 0x287   : > { %v690_v56 = vpop.f32.mrf.mxu3 }
 0x28f   : > { %v720_v57 = vpop.f32.mrf.mxu3 }
 0x290   : > { %v724_v58 = vsel %vm640_vm3, -10000.0, %v720_v57 }
 0x291   : > { %v725_v59 = vsel %vm641_vm2, %v724_v58, -inf }
 0x292   : > { %726 = vmax.xlane.f32.xlu2 %v725_v59 }
 0x297   : > { %v722_v60 = vpop.f32.mrf.mxu3 }
 0x298   : > { %v1743_v60 = vmov 32.0  }
 0x29f   : > { %v849_v61 = vpop.f32.mrf.mxu3 }
 0x2a0   : > { %v853_v62 = vsel %vm640_vm3, -10000.0, %v849_v61 }
 0x2a1   : > { %v854_v63 = vsel %vm641_vm2, %v853_v62, -inf }
 0x2a2   : > { %855 = vmax.xlane.f32.xlu0 %v854_v63 }
 0x2a7   : > { %v851_v0 = vpop.f32.mrf.mxu3 }
 0x2aa   : > { %864 = vrot.lane.b32.xlu2 %v737_v37, %s1737_s11 }
 0x2b6   : > { %801 = vrot.lane.b32.xlu0 %v737_v37, %s1739_s23 }
 0x2d3   : > { %798 = vadd.xlane.f32.xlu2 %v797_v7 }
 0x2e0   : > { %669 = vadd.xlane.f32.xlu0 %v668_v8 }
 0x305   : > { %v727_v9 = vpop.xlane.xlu2 %726 }
 0x306   : > { %v728_v10 = vsub.f32 %v724_v58, %v727_v9 }
 0x308   : > { %v729_v11 = vmul.f32 1.442695, %v728_v10 }
 0x30a   : > { %1376 = vpow2.f32 %v729_v11 }
 0x30d   : > { %v865_v12 = vpop.permute.xlu2 %864 }
 0x30e   : > { %v870_v13 = vsel %vm675_vm4, %v865_v12, 0 }
 0x30f   : > { %879 = vmatpush.bf16.msra.mxu2 %v870_v13 }
 0x310   : > { %v1377_v14 = vpop.eup %1376 }
 0x311   : > { %v731_v15 = vsel %vm641_vm2, %v1377_v14, 0.0  ;;  %v734_v16 = vpack.c.bf16 %v1377_v14, %v1377_v14 }
 0x312   : > { %732 = vadd.xlane.f32.xlu1 %v731_v15 }
 0x313   : > { %1226 = vmatmul.msk.bf16.vlgmr.msrb.gmra.mxu2 %vm641_vm2, %v734_v16 }
 0x315   : > { %v856_v17 = vpop.xlane.xlu0 %855 }
 0x316   : > { %v857_v18 = vsub.f32 %v853_v62, %v856_v17 }
 0x318   : > { %v858_v19 = vmul.f32 1.442695, %v857_v18 }
 0x31a   : > { %1378 = vpow2.f32 %v858_v19 }
 0x320   : > { %v1379_v20 = vpop.eup %1378 }
 0x321   : > { %v863_v21 = vpack.c.bf16 %v1379_v20, %v1379_v20  ;;  %v860_v22 = vsel %vm641_vm2, %v1379_v20, 0.0 }
 0x322   : > { %861 = vadd.xlane.f32.xlu1 %v860_v22 }
 0x323   : > { %1230 = vmatmul.msk.bf16.vlgmr.msra.gmra.mxu2 %vm641_vm2, %v863_v21 }
 0x328   : > { %v802_v23 = vpop.permute.xlu0 %801 }
 0x329   : > { %v807_v24 = vsel %vm675_vm4, %v802_v23, 0 }
 0x32a   : > { %816 = vmatpush.bf16.msrb.mxu1 %v807_v24 }
 0x32d   : > { %1228 = vmatmul.msk.bf16.vlgmr.msrb.gmra.mxu1 %vm641_vm2, %v800_v25 }
 0x346   : > { %v799_v35 = vpop.xlane.xlu2 %798 }
 0x353   : > { %v670_v26 = vpop.xlane.xlu0 %669 }
 0x354   : > { %1380 = vrcp.f32 %v670_v26 }
 0x35a   : > { %v1381_v27 = vpop.eup %1380 }
 0x35b   : > { %v693_v28 = vmul.f32 %v1381_v27, %v688_v55 }
 0x35d   : > { %694 = vst.msk [vmem:[#allocation3] sm:$0xff] %vm641_vm2, %v693_v28 }
 0x385   : > { %v733_v29 = vpop.xlane.xlu1 %732 }
 0x386   : > { %1382 = vrcp.f32 %v733_v29 }
 0x38c   : > { %v1383_v30 = vpop.eup %1382 }
 0x395   : > { %v862_v33 = vpop.xlane.xlu1 %861 }
 0x396   : > { %v755_v31 = vpop.f32.mrf.mxu2  ;;  %1384 = vrcp.f32 %v862_v33 }
 0x397   : > { %v760_v32 = vmul.f32 %v1383_v30, %v755_v31  ;;  %1386 = vrcp.f32 %v799_v35 }
 0x398   : > { %1388 = vrcp.f32 %v1743_v60 }
 0x399   : > { %762 = vrot.lane.b32.xlu1 %v760_v32, %s1740_s14 }
 0x39c   : > { %v1385_v36 = vpop.eup %1384 }
 0x39d   : > { %v1387_v39 = vpop.eup %1386 }
 0x39e   : > { %v757_v34 = vpop.f32.mrf.mxu2  ;;  %v1389_v61 = vpop.eup %1388 }
 0x39f   : > { %v936_v62 = vmul.f32 32.0, %v1389_v61  ;;  %vm940_vm8 = vweird.f32 %v1389_v61 }
 0x3a1   : > { %v937_v63 = vsub.f32 1.0, %v936_v62 }
 0x3a3   : > { %v938_v0 = vmul.f32 %v1389_v61, %v937_v63 }
 0x3a5   : > { %v939_v1 = vadd.f32 %v1389_v61, %v938_v0 }
 0x3a6   : > { %v881_v37 = vpop.f32.mrf.mxu2 }
 0x3a7   : > { %v886_v38 = vmul.f32 %v1385_v36, %v881_v37  ;;  %v941_v2 = vsel %vm940_vm8, %v1389_v61, %v939_v1 }
 0x3a9   : > { %888 = vrot.lane.b32.xlu2 %v886_v38, %s1741_s19 }
 0x3aa   : > { %v818_v40 = vpop.f32.mrf.mxu1 }
 0x3ab   : > { %v823_v41 = vmul.f32 %v1387_v39, %v818_v40 }
 0x3ad   : > { %825 = vrot.lane.b32.xlu1 %v823_v41, %s1742_s25 }
 0x3ae   : > { %v883_v42 = vpop.f32.mrf.mxu2 }
 0x3b2   : > { %v820_v43 = vpop.f32.mrf.mxu1 }
 0x403   : > { %v889_v50 = vpop.permute.xlu2 %888 }
 0x40b   : > { %v763_v48 = vpop.permute.xlu1 %762 }
 0x40c   : > { %766 = vst.msk [vmem:[#allocation3] sm:$0xff] %vm765_vm5, %v763_v48 }
 0x41f   : > { %v826_v49 = vpop.permute.xlu1 %825 }
 0x420   : > { %829 = vst.msk [vmem:[#allocation3] sm:$0xff] %vm828_vm6, %v826_v49 }
 0x421   : > { %892 = vst.msk [vmem:[#allocation3] sm:$0xff] %vm891_vm7, %v889_v50 }
 0x428   : > { %v893_v51 = vld [vmem:[#allocation3] sm:$0xff] }
 0x429   : > { %v894_v52 = vpack.c.bf16 %v893_v51, %v893_v51 }
 0x42b   : > { %1239 = vmatmul.msk.bf16.vlgmr.msra.gmra.mxu0 %vm567_vm0, %v894_v52 }
 0x4a8   : > { %v928_v54 = vpop.f32.mrf.mxu0 }
 0x4a9   : > { %v929_v55 = vadd.f32 %v928_v54, %v899_v53 }
 0x4ab   : > { %v932_v56 = vsel %vm567_vm0, %v929_v55, 0.0  ;;  %v943_v57 = vmul.f32 %v929_v55, %v929_v55 }
 0x4ac   : > { %933 = vadd.xlane.f32.xlu1 %v932_v56 }
 0x4ad   : > { %v944_v58 = vsel %vm567_vm0, %v943_v57, 0.0 }
 0x4ae   : > { %945 = vadd.xlane.f32.xlu0 %v944_v58 }
 0x4b0   : > { %v930_v59 = vpop.f32.mrf.mxu0 }
 0x51f   : > { %v934_v3 = vpop.xlane.xlu1 %933 }
 0x520   : > { %v942_v4 = vmul.f32 %v941_v2, %v934_v3 }
 0x521   : > { %v946_v5 = vpop.xlane.xlu0 %945 }
 0x522   : > { %v948_v6 = vmul.f32 %v942_v4, %v942_v4  ;;  %v947_v7 = vmul.f32 %v946_v5, %v941_v2  ;;  %v950_v16 = vsub.f32 %v929_v55, %v942_v4 }
 0x524   : > { %v949_v8 = vsub.f32 %v947_v7, %v948_v6 }
 0x526   : > { %v951_v9 = vadd.f32 1e-05, %v949_v8 }
 0x528   : > { %1390 = vrsqrt.f32 %v951_v9  ;;  %vm958_vm10 = vweird.f32 %v951_v9 }
 0x52e   : > { %v1391_v10 = vpop.eup %1390 }
 0x52f   : > { %v953_v11 = vmul.f32 %v1391_v10, %v951_v9  ;;  %vm959_vm9 = vweird.f32 %v1391_v10 }
 0x530   : > { %vm960_vm11 = vmor %vm958_vm10, %vm959_vm9 }
 0x531   : > { %v954_v12 = vmul.f32 %v1391_v10, %v953_v11 }
 0x533   : > { %v955_v13 = vmul.f32 0.5, %v954_v12 }
 0x535   : > { %v956_v14 = vsub.f32 1.5, %v955_v13 }
 0x537   : > { %v957_v15 = vmul.f32 %v1391_v10, %v956_v14 }
 0x539   : > { %v961_v17 = vsel %vm960_vm11, %v1391_v10, %v957_v15 }
 0x53a   : > { %v962_v18 = vmul.f32 %v961_v17, %v950_v16 }
 0x53c   : > { %963 = vst.msk [vmem:[%s545_s26] sm:$0xff] %vm567_vm0, %v962_v18 }
 0x53d   : > { %1659 = shalt.err (!%p1656_p0)
}
 0x53e   : > { %1272 = dma.vmem_to_hbm [thread:$0]  (%p1869_p5), %s979_s15, 128, %s981_s1, %s965_s30  }
 0x53f PF: > { %s2134_s16 = sld [smem:[#allocation25_spill]]  ;;  %p1301_p3 = pnand %p1184_p11, %p1834_p6 }
 0x540   : > { %s2136_s11 = sld [smem:[#allocation27_spill]] }
 0x541   : > { %p1302_p7 = pneg %p1301_p3 }
 0x545   : > { %s992_s13 = sand.u32 1, %s2134_s16  }
 0x546   : > { %s993_s23 = scalar_lea.sflag [#allocation6], %s992_s13 }
 0x547   : > { %1705 = dma.done.wait (%p1302_p7), %s993_s23, 128  }
 0x548   : > { %1707 = vsyncadd (%p1302_p7), %s993_s23, 4294967168  ;;  %s32_s10 = sadd.s32 1, %s2136_s11   ;;  %s2137_s14 = sld [smem:[#allocation26_spill]] }
 0x549   : > { %p29_p9 = scmp.ge.s32.totalorder %s32_s10, 4   ;;  %s2138_s29 = sld [smem:[#allocation31_spill]] }
 0x54a   : > { %s2139_s19 = sld [smem:[#allocation29_spill]]  ;;  %s2140_s27 = smov %s1714_s28 }
 0x54b   : > { %s2142_s30 = smov %s1726_s9 }
 0x54c   :  { %31 = sbr.rel (!%p29_p9) target bundleno = 18 (0x12), region = 161 }
 0x54e   : > { %s2141_s28 = smov %s2137_s14 }
 0x550   : > { %s2143_s9 = smov %s2139_s19 }
 0x551   :  { %999 = vsyncpa [#allocation5], 1 }
 0x552   :  { %1001 = vsyncpa [#allocation5 + $0x1], 1 }
 0x553   :  { %1002 = vsyncpa [#allocation8], 1 }
 0x554   :  { %1004 = vsyncpa [#allocation8 + $0x1], 1 }
 0x555   :  { %1005 = vsyncpa [#allocation11], 1 }
 0x556   :  { %1007 = vsyncpa [#allocation11 + $0x1], 1 }
 0x557   :  { %1008 = vsyncpa [#allocation14], 1 }
 0x558   :  { %1009 = vsyncpa [#allocation17], 1 }
 0x559   :  { %1010 = vsyncpa [#allocation6], 1 }
 0x55a   :  { %1012 = vsyncpa [#allocation6 + $0x1], 1 }

</bundles_post_ra>
